<compile_context>
chip_gen: v6e
topology: v6e:2x2x1
jax: 0.10.0
libtpu: 0.0.40
codegen_flags: <defaults>
</compile_context>

<pallas_src>
import functools

import jax
import jax.numpy as jnp
from jax.experimental import pallas as pl
from jax.experimental.pallas import tpu as pltpu

LANE_CANDIDATES = (512, 256, 128)     # widest lane width that divides numel wins
MAX_BLOCK_ELEMS = 1024 * 512          # ~2 MiB per f32 operand block
VMEM_REQUEST_CAP = 28 * 1024 * 1024   # explicit scoped-VMEM request ceiling


def _round_up(x, m):
    return ((x + m - 1) // m) * m


@functools.lru_cache(maxsize=1)
def _physical_vmem_bytes():
    try:
        info = pltpu.get_tpu_info()
        v = getattr(info, "vmem_capacity_bytes", None)
        if v:
            return int(v)
    except Exception:
        pass
    return 64 * 1024 * 1024            # conservative default (v7x per-TC VMEM)


def _tile_budget(lane_w):
    """Return (max tile rows, vmem_limit_bytes) sized from this chip's VMEM."""
    vmem_limit = int(min(_physical_vmem_bytes() // 2, VMEM_REQUEST_CAP))
    per_row = 3 * 2 * lane_w * 4       # <= 3 f32 streams, double buffered
    max_rows = (vmem_limit * 3 // 4) // per_row   # 25% headroom for temporaries
    max_rows = max(8, (max_rows // 8) * 8)
    return min(MAX_BLOCK_ELEMS // lane_w, max_rows), vmem_limit


def _choose_tile_r(rows, max_rows):
    if rows <= 8:
        return rows                    # single full-extent block (tiny input)
    # Keep >= 2 grid blocks so v7x's two TensorCores both get work.
    half = _round_up(-(-rows // 2), 8)
    return max(8, min(max_rows, half))


def _bce_terms(x, y):
    """Stable BCEWithLogits pieces:
         BCE(x, y)   = max(x,0)       - x*y + log1p(exp(-|x|)) = relu_x + base
         BCE(-x, -y) = max(x,0) - x   - x*y + log1p(exp(-|x|)) = relu_x - x + base
    """
    relu_x = jnp.maximum(x, 0.0)
    base = jnp.log1p(jnp.exp(-jnp.abs(x))) - x * y
    return relu_x, base


def _bce_elem_kernel(x_ref, y_ref, o_ref, *, margin):
    x = x_ref[...].astype(jnp.float32)
    y = y_ref[...].astype(jnp.float32)
    pos = (y > margin).astype(jnp.float32)
    neg = (y < -margin).astype(jnp.float32)
    relu_x, base = _bce_terms(x, y)
    # pos*(relu_x + base) + neg*(relu_x - x + base)
    o_ref[...] = ((pos + neg) * (relu_x + base) - neg * x).astype(o_ref.dtype)


def _partial_reduce(v, tile_r, lane_w, out_sub):
    """(tile_r, lane_w) f32 -> (out_sub, 128) partial sums.

    Sublane-group reduction via an aligned reshape, then lane-group reduction via
    static 128-wide slices; both stay (8,128)-tile aligned (pure VALU adds).
    """
    v = jnp.sum(v.reshape(tile_r // out_sub, out_sub, lane_w), axis=0)
    acc = v[:, 0:128]
    for c in range(1, lane_w // 128):
        acc = acc + v[:, c * 128:(c + 1) * 128]
    return acc


def _bce_reduce_kernel(x_ref, y_ref, ls_ref, un_ref, *,
                       margin, tile_r, lane_w, out_sub, needs_mask, last_valid):
    x = x_ref[...].astype(jnp.float32)
    y = y_ref[...].astype(jnp.float32)

    pos_b = y > margin
    neg_b = y < -margin
    if needs_mask:
        # Only the last grid block has OOB / padded elements; all other blocks get
        # limit == block_elems (mask trivially true).  In-block flat index is
        # <= tile_r*lane_w <= 2**19, so int32 is safe.
        block_elems = tile_r * lane_w
        limit = jnp.where(pl.program_id(0) == pl.num_programs(0) - 1,
                          jnp.int32(last_valid), jnp.int32(block_elems))
        r = jax.lax.broadcasted_iota(jnp.int32, (tile_r, lane_w), 0)
        c = jax.lax.broadcasted_iota(jnp.int32, (tile_r, lane_w), 1)
        valid = (r * lane_w + c) < limit
        pos_b = jnp.logical_and(pos_b, valid)
        neg_b = jnp.logical_and(neg_b, valid)

    pos = pos_b.astype(jnp.float32)
    neg = neg_b.astype(jnp.float32)
    relu_x, base = _bce_terms(x, y)
    loss = (pos + neg) * (relu_x + base) - neg * x
    if needs_mask:
        # OOB rows of a ragged last block contain unspecified data; kill any
        # 0*inf / 0*nan before it reaches the reduction.
        loss = jnp.where(valid, loss, 0.0)
    union = jnp.maximum(pos, neg)

    ls_ref[...] = _partial_reduce(loss, tile_r, lane_w, out_sub)
    un_ref[...] = _partial_reduce(union, tile_r, lane_w, out_sub)


def _as_2d(a, n, rows, lane_w):
    flat = a.reshape(-1)
    n_pad = rows * lane_w
    if n_pad != n:
        # TODO(synk): padded fallback costs one extra HBM pass per input; it is only
        # taken when numel is not a multiple of 128 (aligned sizes reshape for free).
        flat = jnp.pad(flat, (0, n_pad - n))
    return flat.reshape(rows, lane_w)


def bce_loss(inputs, targets, margin=0.0, reduce=None, size_average=None,
             out_dtype=None):
    """JAX/Pallas equivalent of loss/DSRB.py::BCELoss.forward.

    out_dtype: opt-in output dtype for the elementwise (reduce falsy) path;
    defaults to float32 to match the PyTorch module (`input.float()` semantics).
    """
    orig_shape = inputs.shape
    n = int(inputs.size)

    lane_w = next((c for c in LANE_CANDIDATES if n % c == 0), None)
    padded = lane_w is None
    if padded:
        lane_w = LANE_CANDIDATES[0]
    rows = -(-n // lane_w)

    max_rows, vmem_limit = _tile_budget(lane_w)
    tile_r = _choose_tile_r(rows, max_rows)
    num_blocks = -(-rows // tile_r)
    block_elems = tile_r * lane_w
    needs_mask = num_blocks * block_elems != n
    last_valid = n - (num_blocks - 1) * block_elems

    x2 = _as_2d(inputs, n, rows, lane_w)
    y2 = _as_2d(targets, n, rows, lane_w)

    cparams = pltpu.CompilerParams(dimension_semantics=("parallel",),
                                   vmem_limit_bytes=vmem_limit)
    in_specs = [pl.BlockSpec((tile_r, lane_w), lambda i: (i, 0)),
                pl.BlockSpec((tile_r, lane_w), lambda i: (i, 0))]

    if reduce:
        out_sub = 8 if tile_r % 8 == 0 else tile_r   # out_sub != 8 only when 1 block
        kernel = functools.partial(
            _bce_reduce_kernel, margin=float(margin), tile_r=tile_r, lane_w=lane_w,
            out_sub=out_sub, needs_mask=needs_mask, last_valid=last_valid)
        part_loss, part_union = pl.pallas_call(
            kernel,
            out_shape=(jax.ShapeDtypeStruct((num_blocks * out_sub, 128), jnp.float32),
                       jax.ShapeDtypeStruct((num_blocks * out_sub, 128), jnp.float32)),
            grid_spec=pltpu.PrefetchScalarGridSpec(
                num_scalar_prefetch=0,
                grid=(num_blocks,),
                in_specs=in_specs,
                out_specs=[pl.BlockSpec((out_sub, 128), lambda i: (i, 0)),
                           pl.BlockSpec((out_sub, 128), lambda i: (i, 0))]),
            compiler_params=cparams,
        )(x2, y2)

        sum_loss = jnp.sum(part_loss)    # loss is zero off-mask -> masked sum
        count = jnp.sum(part_union)      # number of union-mask elements
        if size_average:
            # Empty mask => loss == 0 everywhere, so torch.mean(loss) == 0.
            return jnp.where(count > 0, sum_loss / jnp.maximum(count, 1.0),
                             jnp.float32(0.0))
        # Masked sum == full sum (loss is zero off-mask); matches empty-mask branch.
        return sum_loss

    out_dt = jnp.dtype(out_dtype) if out_dtype is not None else jnp.float32
    kernel = functools.partial(_bce_elem_kernel, margin=float(margin))
    loss2 = pl.pallas_call(
        kernel,
        out_shape=jax.ShapeDtypeStruct((rows, lane_w), out_dt),
        grid_spec=pltpu.PrefetchScalarGridSpec(
            num_scalar_prefetch=0,
            grid=(num_blocks,),
            in_specs=in_specs,
            out_specs=pl.BlockSpec((tile_r, lane_w), lambda i: (i, 0))),
        compiler_params=cparams,
    )(x2, y2)

    if padded:
        return loss2.reshape(-1)[:n].reshape(orig_shape)
    return loss2.reshape(orig_shape)      # free reshape on the aligned path


def _reference(inputs, targets, margin=0.0):
    """Pure-JAX reference matching the PyTorch module (reduce falsy path)."""
    x = inputs.astype(jnp.float32)
    y = targets.astype(jnp.float32)
    pos = (y > margin).astype(jnp.float32)
    neg = (y < -margin).astype(jnp.float32)
    bce = lambda a, b: jnp.maximum(a, 0.0) - a * b + jnp.log1p(jnp.exp(-jnp.abs(a)))
    return pos * bce(x, y) + neg * bce(-x, -y)


if __name__ == "__main__":
    def run_case(shape, margin, seed):
        kx, kt = jax.random.split(jax.random.PRNGKey(seed))
        x = jax.random.normal(kx, shape, dtype=jnp.float32)
        # Targets in {-1, 0, +1} so both positive and negative masks fire.
        t = jax.random.randint(kt, shape, -1, 2).astype(jnp.float32)
        ref = _reference(x, t, margin)

        out = jax.block_until_ready(bce_loss(x, t, margin=margin))
        assert out.shape == shape and out.dtype == jnp.float32
        assert jnp.allclose(out, ref, atol=1e-5, rtol=1e-5), "elementwise mismatch"

        red_sum = jax.block_until_ready(bce_loss(x, t, margin=margin, reduce=True))
        red_mean = jax.block_until_ready(
            bce_loss(x, t, margin=margin, reduce=True, size_average=True))
        union = (t > margin) | (t < -margin)
        ref_sum = jnp.sum(jnp.where(union, ref, 0.0))
        cnt = jnp.sum(union.astype(jnp.float32))
        ref_mean = jnp.where(cnt > 0, ref_sum / jnp.maximum(cnt, 1.0), 0.0)
        assert red_sum.shape == () and red_mean.shape == ()
        assert jnp.allclose(red_sum, ref_sum, atol=1e-2, rtol=1e-4), "sum mismatch"
        assert jnp.allclose(red_mean, ref_mean, atol=1e-4, rtol=1e-4), "mean mismatch"

    seed = jax.random.PRNGKey(0)  # deterministic base key (cases fold in small seeds)

    # Primary module-like shape (NCHW): aligned, single block, no padding/masking.
    run_case((2, 4, 16, 16), 0.0, 0)
    run_case((2, 4, 16, 16), 0.5, 1)
    # Multi-block aligned path (exercises the parallel grid / partial reductions).
    run_case((8, 8, 32, 32), 0.0, 2)
    # numel % 512 != 0 but % 128 == 0: narrower lanes, ragged last block (mask path).
    run_case((33, 128), 0.0, 3)
    run_case((33, 128), -0.25, 4)   # negative margin with a masked tail
    # numel not a multiple of 128: padded fallback path.
    run_case((3, 5, 7, 11), 0.0, 5)

    print("KERNEL_OK")
</pallas_src>

<mosaic_0001>
module attributes {stable_mosaic.version = 11 : i64} {
  func.func @_bce_elem_kernel(%arg0: i32, %arg1: memref<4x512xf32, #tpu.memory_space<vmem>>, %arg2: memref<4x512xf32, #tpu.memory_space<vmem>>, %arg3: memref<4x512xf32, #tpu.memory_space<vmem>>) attributes {dimension_semantics = [#tpu.dimension_semantics<parallel>], iteration_bounds = array<i64: 1>, scalar_prefetch = 0 : i64, scratch_operands = 0 : i64, tpu.core_type = #tpu.core_type<tc>, window_params = [{transform_indices = @transform_0, window_bounds = array<i64: 4, 512>}, {transform_indices = @transform_1, window_bounds = array<i64: 4, 512>}, {transform_indices = @transform_2, window_bounds = array<i64: 4, 512>}]} {
    %c0 = arith.constant 0 : index
    %c0_0 = arith.constant 0 : index
    %0 = vector.load %arg1[%c0, %c0_0] : memref<4x512xf32, #tpu.memory_space<vmem>>, vector<4x512xf32>
    %c0_1 = arith.constant 0 : index
    %c0_2 = arith.constant 0 : index
    %1 = vector.load %arg2[%c0_1, %c0_2] : memref<4x512xf32, #tpu.memory_space<vmem>>, vector<4x512xf32>
    %cst = arith.constant 0.000000e+00 : f32
    %2 = vector.broadcast %cst : f32 to vector<4x512xf32>
    %3 = arith.cmpf ogt, %1, %2 : vector<4x512xf32>
    %4 = arith.extui %3 : vector<4x512xi1> to vector<4x512xi32>
    %5 = arith.sitofp %4 : vector<4x512xi32> to vector<4x512xf32>
    %cst_3 = arith.constant -0.000000e+00 : f32
    %6 = vector.broadcast %cst_3 : f32 to vector<4x512xf32>
    %7 = arith.cmpf olt, %1, %6 : vector<4x512xf32>
    %8 = arith.extui %7 : vector<4x512xi1> to vector<4x512xi32>
    %9 = arith.sitofp %8 : vector<4x512xi32> to vector<4x512xf32>
    %cst_4 = arith.constant 0.000000e+00 : f32
    %10 = vector.broadcast %cst_4 : f32 to vector<4x512xf32>
    %11 = arith.maximumf %0, %10 : vector<4x512xf32>
    %12 = math.absf %0 : vector<4x512xf32>
    %cst_5 = arith.constant 0.000000e+00 : f32
    %13 = vector.broadcast %cst_5 : f32 to vector<4x512xf32>
    %14 = arith.subf %13, %12 : vector<4x512xf32>
    %15 = math.exp %14 : vector<4x512xf32>
    %16 = math.log1p %15 : vector<4x512xf32>
    %17 = arith.mulf %0, %1 : vector<4x512xf32>
    %18 = arith.subf %16, %17 : vector<4x512xf32>
    %19 = arith.addf %5, %9 : vector<4x512xf32>
    %20 = arith.addf %11, %18 : vector<4x512xf32>
    %21 = arith.mulf %19, %20 : vector<4x512xf32>
    %22 = arith.mulf %9, %0 : vector<4x512xf32>
    %23 = arith.subf %21, %22 : vector<4x512xf32>
    %c0_6 = arith.constant 0 : index
    %c0_7 = arith.constant 0 : index
    %24 = vector.load %arg3[%c0_6, %c0_7] : memref<4x512xf32, #tpu.memory_space<vmem>>, vector<4x512xf32>
    tpu.vector_store %arg3[%c0_6, %c0_7], %23 {strides = array<i32>} : memref<4x512xf32, #tpu.memory_space<vmem>>, vector<4x512xf32>,
    return
  }
  func.func @transform_0(%arg0: i32) -> (i32, i32) {
    %c0_i32 = arith.constant 0 : i32
    %c0_i32_0 = arith.constant 0 : i32
    return %arg0, %c0_i32 : i32, i32
  }
  func.func @transform_1(%arg0: i32) -> (i32, i32) {
    %c0_i32 = arith.constant 0 : i32
    %c0_i32_0 = arith.constant 0 : i32
    return %arg0, %c0_i32 : i32, i32
  }
  func.func @transform_2(%arg0: i32) -> (i32, i32) {
    %c0_i32 = arith.constant 0 : i32
    %c0_i32_0 = arith.constant 0 : i32
    return %arg0, %c0_i32 : i32, i32
  }
}

</mosaic_0001>

<bundles_post_ra>
// kernel: tpu_custom_call.1
= control target key start
LH: loop header
LB: loop body
LE: loop exit
PB: predicated region body
PF: predicated region fallthrough
CT: control target
= control target key end

     0   :  { %7 = vsyncpa [#allocation3], 0  ;;  %s222_s0 = inlined_call_operand.hbm [shape: f32[4,512], index: 0, kind: input, shape index: {}]   ;;  %s223_s1 = inlined_call_operand.hbm [shape: f32[4,512], index: 1, kind: input, shape index: {}]   ;;  %s224_s2 = inlined_call_operand.hbm [shape: f32[4,512], index: 2, kind: output, shape index: {}]  }
   0x1   :  { %8 = vsyncpa [#allocation6], 0 }
   0x2   :  { %9 = vsyncpa [#allocation4], 0  ;;  %s194_s9 = smov [#allocation2]   ;;  %s195_s11 = smov [#allocation5]  }
   0x3   :  { %s16_s10 = sshll.u32 %s194_s9, 4  ;;  %s26_s12 = sshll.u32 %s195_s11, 4  ;;  %s17_s10 = int_to_ptr.vmem [resolvable:$true] %s16_s10  ;;  %s27_s12 = int_to_ptr.vmem [resolvable:$true] %s26_s12 }
   0x4   :  { %s136_s13 = scalar_lea.vmem %s17_s10, 256  ;;  %p141_p1 = scmp.lt.s32.totalorder %s17_s10, %s17_s10 }
   0x5   :  { %p137_p0 = scmp.ne.s32.totalorder %s17_s10, %s136_s13  ;;  %p142_p2 = scmp.lt.s32.totalorder %s136_s13, %s136_s13 }
   0x7   :  { %p143_p3 = por %p142_p2, %p141_p1 }
   0x9   :  { %p144_p4 = pnand %p143_p3, %p137_p0 }
   0xb   :  { %147 = shalt.err (!%p144_p4)
}
   0xc   :  { %19 = dma.hbm_to_vmem [thread:$0]  %s222_s0, 256, %s17_s10, [#allocation3]  }
   0xd   :  { %s156_s16 = scalar_lea.vmem %s27_s12, 256  ;;  %p161_p6 = scmp.lt.s32.totalorder %s27_s12, %s27_s12 }
   0xe   :  { %p157_p5 = scmp.ne.s32.totalorder %s27_s12, %s156_s16  ;;  %p162_p7 = scmp.lt.s32.totalorder %s156_s16, %s156_s16 }
  0x10   :  { %p163_p8 = por %p162_p7, %p161_p6 }
  0x12   :  { %p164_p9 = pnand %p163_p8, %p157_p5 }
  0x14   :  { %167 = shalt.err (!%p164_p9)
}
  0x15   :  { %29 = dma.hbm_to_vmem [thread:$0]  %s223_s1, 256, %s27_s12, [#allocation6]  }
  0x16   :  { %188 = dma.done.wait [#allocation3], 256  }
  0x17   :  { %189 = vsyncadd [#allocation3], 4294967040 }
  0x18   :  { %190 = dma.done.wait [#allocation6], 256  }
  0x19   :  { %191 = vsyncadd [#allocation6], 4294967040  ;;  %v36_v0 = vld [vmem:[#allocation2] sm:$0xff]  ;;  %v37_v2 = vld [vmem:[#allocation2 + $0x8] sm:$0xff]  ;;  %v196_v21 = vmov 0.0   ;;  %s197_s0 = smov [#allocation7]  }
  0x1a   :  { %v54_v1 = vand.u32 2147483647, %v36_v0  ;;  %v55_v4 = vand.u32 2147483647, %v37_v2  ;;  %v38_v15 = vld [vmem:[#allocation5] sm:$0xff]  ;;  %v39_v25 = vld [vmem:[#allocation5 + $0x8] sm:$0xff] }
  0x1b   :  { %vm40_vm0 = vcmp.gt.f32.partialorder %v38_v15, 0.0  ;;  %vm46_vm1 = vcmp.lt.f32.partialorder %v38_v15, -0.0  ;;  %v80_v24 = vmul.f32 %v38_v15, %v36_v0  ;;  %vm41_vm3 = vcmp.gt.f32.partialorder %v39_v25, 0.0  ;;  %s102_s1 = sshll.u32 %s197_s0, 4  ;;  %s103_s1 = int_to_ptr.vmem [resolvable:$true] %s102_s1 }
  0x1c   :  { %v56_v3 = vsub.f32 0.0, %v54_v1  ;;  %v57_v6 = vsub.f32 0.0, %v55_v4  ;;  %v112_v22 = vsel %vm40_vm0, 1.0, %v196_v21  ;;  %v114_v23 = vsel %vm46_vm1, 1.0, %v196_v21  ;;  %s168_s19 = scalar_lea.vmem %s103_s1, 256  ;;  %p173_p11 = scmp.lt.s32.totalorder %s103_s1, %s103_s1 }
  0x1d   :  { %vm47_vm4 = vcmp.lt.f32.partialorder %v39_v25, -0.0  ;;  %v52_v27 = vmax.f32 %v36_v0, 0.0  ;;  %v84_v31 = vadd.f32 %v114_v23, %v112_v22  ;;  %v81_v32 = vmul.f32 %v39_v25, %v37_v2  ;;  %p169_p10 = scmp.ne.s32.totalorder %s103_s1, %s168_s19  ;;  %p174_p12 = scmp.lt.s32.totalorder %s168_s19, %s168_s19 }
  0x1e   :  { %v58_v5 = vmul.f32 1.442695, %v56_v3  ;;  %v60_v7 = vmul.f32 1.442695, %v57_v6  ;;  %v113_v34 = vsel %vm41_vm3, 1.0, %v196_v21  ;;  %v115_v35 = vsel %vm47_vm4, 1.0, %v196_v21 }
  0x1f   :  { %v53_v37 = vmax.f32 %v37_v2, 0.0  ;;  %v90_v39 = vmul.f32 %v114_v23, %v36_v0  ;;  %v85_v42 = vadd.f32 %v115_v35, %v113_v34  ;;  %v91_v45 = vmul.f32 %v115_v35, %v37_v2  ;;  %p175_p13 = por %p174_p12, %p173_p11 }
  0x20   :  { %120 = vpow2.f32 %v58_v5 }
  0x21   :  { %122 = vpow2.f32 %v60_v7  ;;  %p176_p0 = pnand %p175_p13, %p169_p10 }
  0x2d   :  { %v121_v8 = vpop.eup %120 }
  0x2e   :  { %v62_v9 = vadd.f32 1.0, %v121_v8  ;;  %v123_v10 = vpop.eup %122  ;;  %v65_v12 = vmul.f32 -0.5, %v121_v8  ;;  %v68_v16 = vand.u32 2147483647, %v121_v8 }
  0x2f   :  { %v71_v11 = vadd.f32 1.0, %v123_v10  ;;  %v74_v13 = vmul.f32 -0.5, %v123_v10  ;;  %v77_v19 = vand.u32 2147483647, %v123_v10 }
  0x30   :  { %124 = vlog2.f32 %v62_v9  ;;  %v66_v14 = vadd.f32 1.0, %v65_v12  ;;  %vm69_vm2 = vcmp.lt.f32.partialorder %v68_v16, 0.0004427343 }
  0x31   :  { %126 = vlog2.f32 %v71_v11  ;;  %v75_v17 = vadd.f32 1.0, %v74_v13  ;;  %vm78_vm5 = vcmp.lt.f32.partialorder %v77_v19, 0.0004427343 }
  0x32   :  { %v67_v18 = vmul.f32 %v121_v8, %v66_v14 }
  0x33   :  { %v76_v28 = vmul.f32 %v123_v10, %v75_v17 }
  0x3d   :  { %v125_v20 = vpop.eup %124 }
  0x3e   :  { %v64_v26 = vmul.f32 0.6931472, %v125_v20  ;;  %v127_v29 = vpop.eup %126 }
  0x3f   :  { %v73_v36 = vmul.f32 0.6931472, %v127_v29 }
  0x40   :  { %v70_v30 = vsel %vm69_vm2, %v67_v18, %v64_v26 }
  0x41   :  { %v82_v33 = vsub.f32 %v70_v30, %v80_v24  ;;  %v79_v40 = vsel %vm78_vm5, %v76_v28, %v73_v36 }
  0x42   :  { %v83_v41 = vsub.f32 %v79_v40, %v81_v32 }
  0x43   :  { %v86_v38 = vadd.f32 %v82_v33, %v52_v27 }
  0x44   :  { %v87_v44 = vadd.f32 %v83_v41, %v53_v37 }
  0x45   :  { %v88_v43 = vmul.f32 %v86_v38, %v84_v31 }
  0x46   :  { %v89_v47 = vmul.f32 %v87_v44, %v85_v42 }
  0x47   :  { %v92_v46 = vsub.f32 %v88_v43, %v90_v39 }
  0x48   :  { %v93_v48 = vsub.f32 %v89_v47, %v91_v45 }
  0x49   :  { %94 = vst [vmem:[#allocation7] sm:$0xff] %v92_v46 }
  0x4a   :  { %95 = vst [vmem:[#allocation7 + $0x8] sm:$0xff] %v93_v48 }
  0x4b   :  { %179 = shalt.err (!%p176_p0)
}
  0x4c   :  { %105 = dma.vmem_to_hbm [thread:$0]  %s103_s1, 256, %s224_s2, [#allocation4]  }
  0x4d   :  { %192 = dma.done.wait [#allocation4], 256  }
  0x4e   :  { %193 = vsyncadd [#allocation4], 4294967040 }
  0x4f   :  { %109 = vsyncpa [#allocation3], 1 }
  0x50   :  { %110 = vsyncpa [#allocation6], 1 }
  0x51   :  { %111 = vsyncpa [#allocation4], 1 }

</bundles_post_ra>
